<compile_context>
chip_gen: v5e
topology: v5e:2x2
jax: 0.10.0
libtpu: 0.0.40
codegen_flags: <defaults>
</compile_context>

<pallas_src>
import functools
import math

import jax
import jax.numpy as jnp
from jax.experimental import pallas as pl
from jax.experimental.pallas import tpu as pltpu

SUBLANE = 8        # batch tile must be a multiple of this
DEFAULT_LANE = 128 # interior feature padding; use 256 on v6e/v7x when MXU-bound


def _slide(seq, n):
    """Equivalent of the reference `slide(features, 2)`: consecutive windows."""
    return [tuple(seq[i:i + n]) for i in range(len(seq) - n + 1)]


def _round_up(x, m):
    return ((x + m - 1) // m) * m


# ----------------------------- Pallas kernel ------------------------------- #

def _fused_decoder_kernel(*refs, relu_flags):
    """refs = (x_ref, w1_ref, b1_ref, ..., wN_ref, bN_ref, o_ref).

    Whole decode chain in VMEM: matmul (MXU, f32 accumulate) + bias + optional
    ReLU per stage; intermediates never leave VMEM/vregs.
    (The unrolled Python loop keeps a few stage temporaries live; the wrapper's
    VMEM budget accounts for ~3 * tb * max_feature_pad f32 temporaries.)
    """
    n_layers = len(relu_flags)
    x_ref = refs[0]
    o_ref = refs[1 + 2 * n_layers]
    y = x_ref[...].astype(jnp.float32)
    for l in range(n_layers):
        w_ref = refs[1 + 2 * l]
        b_ref = refs[2 + 2 * l]
        # bf16 x bf16 -> f32 accumulate on the MXU (native on v5e/v6e/v7x).
        y = jnp.dot(y.astype(w_ref.dtype), w_ref[...],
                    preferred_element_type=jnp.float32)
        y = y + b_ref[...]              # (1, Fout) bias broadcasts over batch tile
        if relu_flags[l]:
            y = jnp.maximum(y, 0.0)
    o_ref[...] = y.astype(o_ref.dtype)


def fused_decoder_forward(x, weights_pad, biases_pad, relu_flags, *, tb,
                          out_features):
    """One pallas_call for the whole decode path.

    x:            (B, F)  -- unpadded; first layer's K equals F.
    weights_pad:  list of (K_l, N_l) matrices; interior dims zero-padded to the
                  lane multiple, first K and last N unpadded.
    biases_pad:   list of (1, N_l) f32 biases (zero-padded to match N_l).
    """
    B, F = x.shape
    n_layers = len(weights_pad)
    grid = (pl.cdiv(B, tb),)

    operands = [x]
    for w, b in zip(weights_pad, biases_pad):
        operands.extend([w, b])

    # --- cost estimate (advisory, actual itemsizes) ------------------------ #
    rows = grid[0] * tb
    flops = sum(2 * rows * w.shape[0] * w.shape[1] for w in weights_pad)
    w_bytes = sum(w.size * w.dtype.itemsize for w in weights_pad)
    b_bytes = sum(b.size * b.dtype.itemsize for b in biases_pad)
    bytes_accessed = (x.size * x.dtype.itemsize + w_bytes + b_bytes
                      + B * out_features * x.dtype.itemsize)

    # --- VMEM budget -------------------------------------------------------- #
    max_feat = max([F, out_features] + [w.shape[1] for w in weights_pad])
    act_bytes = 2 * tb * F * x.dtype.itemsize            # double-buffered input
    out_bytes = 2 * tb * out_features * x.dtype.itemsize  # double-buffered output
    temp_bytes = 3 * tb * max_feat * 4                    # unrolled f32 temporaries
    vmem_needed = 2 * (w_bytes + b_bytes) + act_bytes + out_bytes + temp_bytes
    vmem_limit = int(min(64 << 20, max(32 << 20, vmem_needed + (4 << 20))))

    kernel = functools.partial(_fused_decoder_kernel,
                               relu_flags=tuple(relu_flags))

    def build(weight_pipeline_mode):
        in_specs = [pl.BlockSpec((tb, F), lambda i: (i, 0))]
        for w, b in zip(weights_pad, biases_pad):
            if weight_pipeline_mode is None:
                in_specs.append(pl.BlockSpec(w.shape, lambda i: (0, 0)))
                in_specs.append(pl.BlockSpec(b.shape, lambda i: (0, 0)))
            else:
                in_specs.append(pl.BlockSpec(w.shape, lambda i: (0, 0),
                                             pipeline_mode=weight_pipeline_mode))
                in_specs.append(pl.BlockSpec(b.shape, lambda i: (0, 0),
                                             pipeline_mode=weight_pipeline_mode))
        out_spec = pl.BlockSpec((tb, out_features), lambda i: (i, 0))
        return pl.pallas_call(
            kernel,
            out_shape=jax.ShapeDtypeStruct((B, out_features), x.dtype),
            grid_spec=pl.GridSpec(grid=grid, in_specs=in_specs,
                                  out_specs=out_spec),
            compiler_params=pltpu.CompilerParams(
                dimension_semantics=("parallel",),   # 2-TC sharding on v7x
                vmem_limit_bytes=vmem_limit),
            cost_estimate=pl.CostEstimate(
                flops=flops, transcendentals=0, bytes_accessed=bytes_accessed),
        )

    try:
        # Grid-invariant operands: single buffer (constant index_map).
        return build(pl.Buffered(1))(*operands)
    except Exception:
        # TODO(synk): pl.Buffered(1) rejected by this jax version; fall back to
        # default double-buffering for the (grid-invariant) weight/bias blocks.
        return build(None)(*operands)


# ------------------------------ Decoder glue -------------------------------- #

class Decoder:
    """Concrete JAX/Pallas port of ADeLEn/decoder.py::Decoder.

    __decode_module__(in, out, activation) == nn.Linear(in, out) (+ ReLU if
    activation).  The skip_connection path is abstract in the reference and not
    implemented here.
    """

    def __init__(self, features, key, skip_connection=False, output_layer=False,
                 param_dtype=jnp.bfloat16, lane_align=DEFAULT_LANE):
        assert not skip_connection  # TODO(synk): __forward_skip_connection__ is abstract in the base class
        self.skip_connection = skip_connection
        self.features = list(features)
        self.param_dtype = param_dtype
        # NOTE: use lane_align=256 on v6e/v7x for large compute-bound layers
        # (2x256^2 MXU); 128 is optimal on v5e and harmless for small layers.

        self.weights = []        # unpadded (in, out), param_dtype — reference path
        self.biases = []         # unpadded (out,), f32
        self.weights_pad = []    # padded interior dims, first K / last N unpadded
        self.biases_pad = []     # (1, N_l), f32, zero-padded
        self.relu_flags = []

        pairs = _slide(features, 2)
        n_feat = len(features)
        for idx, (fin, fout) in enumerate(pairs):
            key, kw, kb = jax.random.split(key, 3)
            bound = 1.0 / math.sqrt(fin)
            # PyTorch Linear default init: U(-1/sqrt(in), 1/sqrt(in)); W is (out, in).
            w = jax.random.uniform(kw, (fout, fin), jnp.float32, -bound, bound)
            b = jax.random.uniform(kb, (fout,), jnp.float32, -bound, bound)
            act = True if (not output_layer or idx < n_feat - 2) else False

            is_first = idx == 0
            is_last = idx == len(pairs) - 1
            k_dim = fin if is_first else _round_up(fin, lane_align)
            n_dim = fout if is_last else _round_up(fout, lane_align)

            w_t = w.T.astype(param_dtype)                      # (in, out)
            # Zero padding is load-bearing: padded W columns / bias entries must
            # be exactly 0 so padded activations stay 0 through ReLU.
            w_pad = jnp.zeros((k_dim, n_dim), param_dtype).at[:fin, :fout].set(w_t)
            b_pad = jnp.zeros((1, n_dim), jnp.float32).at[0, :fout].set(b)

            self.weights.append(w_t)
            self.biases.append(b)
            self.weights_pad.append(w_pad)
            self.biases_pad.append(b_pad)
            self.relu_flags.append(act)

    @staticmethod
    def _default_tb(B):
        # Tiles <= 512 rows (>=85% HBM-roofline regime), padding at most one
        # sublane group per tile; >= 2 grid steps for moderately large batches
        # so ("parallel",) can shard the batch axis across v7x's 2 TensorCores.
        n_steps = pl.cdiv(B, 512)
        if B >= 256:
            n_steps = max(n_steps, 2)
        return max(SUBLANE, _round_up(pl.cdiv(B, n_steps), SUBLANE))

    def __call__(self, x, tb=None):
        B, F = x.shape
        assert F == self.features[0]
        if tb is None:
            tb = self._default_tb(B)
        return fused_decoder_forward(
            x, self.weights_pad, self.biases_pad, self.relu_flags,
            tb=tb, out_features=self.features[-1])

    def reference(self, x):
        """Pure-JAX reference (same bf16 weights / f32 accumulate as the kernel)."""
        y = x.astype(jnp.float32)
        for w, b, act in zip(self.weights, self.biases, self.relu_flags):
            y = jnp.dot(y.astype(w.dtype), w,
                        preferred_element_type=jnp.float32) + b[None, :]
            if act:
                y = jnp.maximum(y, 0.0)
        return y.astype(x.dtype)


# --------------------------------- main ------------------------------------- #

if __name__ == "__main__":
    key = jax.random.PRNGKey(0)
    key, kx, kp = jax.random.split(key, 3)

    features = [32, 16, 8]          # decode path: 32 -> 16 -> 8
    batch = 8
    x = jax.random.normal(kx, (batch, features[0]), jnp.float32)

    dec = Decoder(features, kp, skip_connection=False, output_layer=True)

    out = dec(x)
    out = jax.block_until_ready(out)

    ref = dec.reference(x)
    assert out.shape == (batch, features[-1])
    assert jnp.allclose(out, ref, atol=1e-3, rtol=1e-3)

    print("KERNEL_OK")
</pallas_src>

<mosaic_0001>
module attributes {stable_mosaic.version = 11 : i64} {
  func.func @_fused_decoder_kernel(%arg0: i32, %arg1: memref<8x32xf32, #tpu.memory_space<vmem>>, %arg2: memref<32x128xbf16, #tpu.memory_space<vmem>>, %arg3: memref<1x128xf32, #tpu.memory_space<vmem>>, %arg4: memref<128x8xbf16, #tpu.memory_space<vmem>>, %arg5: memref<1x8xf32, #tpu.memory_space<vmem>>, %arg6: memref<8x8xf32, #tpu.memory_space<vmem>>) attributes {dimension_semantics = [#tpu.dimension_semantics<parallel>], iteration_bounds = array<i64: 1>, scalar_prefetch = 0 : i64, scratch_operands = 0 : i64, tpu.core_type = #tpu.core_type<tc>, window_params = [{transform_indices = @transform_0, window_bounds = array<i64: 8, 32>}, {pipeline_mode = #tpu.pipeline_mode<synchronous>, transform_indices = @transform_1, window_bounds = array<i64: 32, 128>}, {pipeline_mode = #tpu.pipeline_mode<synchronous>, transform_indices = @transform_2, window_bounds = array<i64: 1, 128>}, {pipeline_mode = #tpu.pipeline_mode<synchronous>, transform_indices = @transform_3, window_bounds = array<i64: 128, 8>}, {pipeline_mode = #tpu.pipeline_mode<synchronous>, transform_indices = @transform_4, window_bounds = array<i64: 1, 8>}, {transform_indices = @transform_5, window_bounds = array<i64: 8, 8>}]} {
    %c0 = arith.constant 0 : index
    %c0_0 = arith.constant 0 : index
    %0 = vector.load %arg1[%c0, %c0_0] : memref<8x32xf32, #tpu.memory_space<vmem>>, vector<8x32xf32>
    %1 = arith.truncf %0 : vector<8x32xf32> to vector<8x32xbf16>
    %c0_1 = arith.constant 0 : index
    %c0_2 = arith.constant 0 : index
    %2 = vector.load %arg2[%c0_1, %c0_2] : memref<32x128xbf16, #tpu.memory_space<vmem>>, vector<32x128xbf16>
    %cst = arith.constant dense<0.000000e+00> : vector<8x128xf32>
    %3 = tpu.matmul %1, %2, %cst {dimension_numbers = #tpu.dot_dimension_numbers<[1], [0], [0], [1], [0, 0, 1, 1], [], []>} : vector<8x32xbf16>, vector<32x128xbf16>, vector<8x128xf32> -> vector<8x128xf32>
    %c0_3 = arith.constant 0 : index
    %c0_4 = arith.constant 0 : index
    %4 = vector.load %arg3[%c0_3, %c0_4] : memref<1x128xf32, #tpu.memory_space<vmem>>, vector<1x128xf32>
    %5 = vector.broadcast %4 : vector<1x128xf32> to vector<8x128xf32>
    %6 = arith.addf %3, %5 : vector<8x128xf32>
    %cst_5 = arith.constant 0.000000e+00 : f32
    %7 = vector.broadcast %cst_5 : f32 to vector<8x128xf32>
    %8 = arith.maximumf %6, %7 : vector<8x128xf32>
    %9 = arith.truncf %8 : vector<8x128xf32> to vector<8x128xbf16>
    %c0_6 = arith.constant 0 : index
    %c0_7 = arith.constant 0 : index
    %10 = vector.load %arg4[%c0_6, %c0_7] : memref<128x8xbf16, #tpu.memory_space<vmem>>, vector<128x8xbf16>
    %cst_8 = arith.constant dense<0.000000e+00> : vector<8x8xf32>
    %11 = tpu.matmul %9, %10, %cst_8 {dimension_numbers = #tpu.dot_dimension_numbers<[1], [0], [0], [1], [0, 0, 1, 1], [], []>} : vector<8x128xbf16>, vector<128x8xbf16>, vector<8x8xf32> -> vector<8x8xf32>
    %c0_9 = arith.constant 0 : index
    %c0_10 = arith.constant 0 : index
    %12 = vector.load %arg5[%c0_9, %c0_10] : memref<1x8xf32, #tpu.memory_space<vmem>>, vector<1x8xf32>
    %13 = vector.broadcast %12 : vector<1x8xf32> to vector<8x8xf32>
    %14 = arith.addf %11, %13 : vector<8x8xf32>
    %c0_11 = arith.constant 0 : index
    %c0_12 = arith.constant 0 : index
    %15 = vector.load %arg6[%c0_11, %c0_12] : memref<8x8xf32, #tpu.memory_space<vmem>>, vector<8x8xf32>
    tpu.vector_store %arg6[%c0_11, %c0_12], %14 {strides = array<i32>} : memref<8x8xf32, #tpu.memory_space<vmem>>, vector<8x8xf32>,
    return
  }
  func.func @transform_0(%arg0: i32) -> (i32, i32) {
    %c0_i32 = arith.constant 0 : i32
    %c0_i32_0 = arith.constant 0 : i32
    return %arg0, %c0_i32 : i32, i32
  }
  func.func @transform_1(%arg0: i32) -> (i32, i32) {
    %c0_i32 = arith.constant 0 : i32
    %c0_i32_0 = arith.constant 0 : i32
    %c0_i32_1 = arith.constant 0 : i32
    return %c0_i32, %c0_i32_0 : i32, i32
  }
  func.func @transform_2(%arg0: i32) -> (i32, i32) {
    %c0_i32 = arith.constant 0 : i32
    %c0_i32_0 = arith.constant 0 : i32
    %c0_i32_1 = arith.constant 0 : i32
    return %c0_i32, %c0_i32_0 : i32, i32
  }
  func.func @transform_3(%arg0: i32) -> (i32, i32) {
    %c0_i32 = arith.constant 0 : i32
    %c0_i32_0 = arith.constant 0 : i32
    %c0_i32_1 = arith.constant 0 : i32
    return %c0_i32, %c0_i32_0 : i32, i32
  }
  func.func @transform_4(%arg0: i32) -> (i32, i32) {
    %c0_i32 = arith.constant 0 : i32
    %c0_i32_0 = arith.constant 0 : i32
    %c0_i32_1 = arith.constant 0 : i32
    return %c0_i32, %c0_i32_0 : i32, i32
  }
  func.func @transform_5(%arg0: i32) -> (i32, i32) {
    %c0_i32 = arith.constant 0 : i32
    %c0_i32_0 = arith.constant 0 : i32
    return %arg0, %c0_i32 : i32, i32
  }
}

module attributes {stable_mosaic.version = 11 : i64} {
  func.func @_fused_decoder_kernel(%arg0: i32, %arg1: memref<8x32xf32, #tpu.memory_space<vmem>>, %arg2: memref<32x128xbf16, #tpu.memory_space<vmem>>, %arg3: memref<1x128xf32, #tpu.memory_space<vmem>>, %arg4: memref<128x8xbf16, #tpu.memory_space<vmem>>, %arg5: memref<1x8xf32, #tpu.memory_space<vmem>>, %arg6: memref<8x8xf32, #tpu.memory_space<vmem>>) attributes {dimension_semantics = [#tpu.dimension_semantics<parallel>], iteration_bounds = array<i64: 1>, scalar_prefetch = 0 : i64, scratch_operands = 0 : i64, tpu.core_type = #tpu.core_type<tc>, window_params = [{transform_indices = @transform_0, window_bounds = array<i64: 8, 32>}, {pipeline_mode = #tpu.pipeline_mode<synchronous>, transform_indices = @transform_1, window_bounds = array<i64: 32, 128>}, {pipeline_mode = #tpu.pipeline_mode<synchronous>, transform_indices = @transform_2, window_bounds = array<i64: 1, 128>}, {pipeline_mode = #tpu.pipeline_mode<synchronous>, transform_indices = @transform_3, window_bounds = array<i64: 128, 8>}, {pipeline_mode = #tpu.pipeline_mode<synchronous>, transform_indices = @transform_4, window_bounds = array<i64: 1, 8>}, {transform_indices = @transform_5, window_bounds = array<i64: 8, 8>}]} {
    %c0 = arith.constant 0 : index
    %c0_0 = arith.constant 0 : index
    %0 = vector.load %arg1[%c0, %c0_0] : memref<8x32xf32, #tpu.memory_space<vmem>>, vector<8x32xf32>
    %1 = arith.truncf %0 : vector<8x32xf32> to vector<8x32xbf16>
    %c0_1 = arith.constant 0 : index
    %c0_2 = arith.constant 0 : index
    %2 = vector.load %arg2[%c0_1, %c0_2] : memref<32x128xbf16, #tpu.memory_space<vmem>>, vector<32x128xbf16>
    %cst = arith.constant dense<0.000000e+00> : vector<8x128xf32>
    %3 = tpu.matmul %1, %2, %cst {dimension_numbers = #tpu.dot_dimension_numbers<[1], [0], [0], [1], [0, 0, 1, 1], [], []>} : vector<8x32xbf16>, vector<32x128xbf16>, vector<8x128xf32> -> vector<8x128xf32>
    %c0_3 = arith.constant 0 : index
    %c0_4 = arith.constant 0 : index
    %4 = vector.load %arg3[%c0_3, %c0_4] : memref<1x128xf32, #tpu.memory_space<vmem>>, vector<1x128xf32>
    %5 = vector.broadcast %4 : vector<1x128xf32> to vector<8x128xf32>
    %6 = arith.addf %3, %5 : vector<8x128xf32>
    %cst_5 = arith.constant 0.000000e+00 : f32
    %7 = vector.broadcast %cst_5 : f32 to vector<8x128xf32>
    %8 = arith.maximumf %6, %7 : vector<8x128xf32>
    %9 = arith.truncf %8 : vector<8x128xf32> to vector<8x128xbf16>
    %c0_6 = arith.constant 0 : index
    %c0_7 = arith.constant 0 : index
    %10 = vector.load %arg4[%c0_6, %c0_7] : memref<128x8xbf16, #tpu.memory_space<vmem>>, vector<128x8xbf16>
    %cst_8 = arith.constant dense<0.000000e+00> : vector<8x8xf32>
    %11 = tpu.matmul %9, %10, %cst_8 {dimension_numbers = #tpu.dot_dimension_numbers<[1], [0], [0], [1], [0, 0, 1, 1], [], []>} : vector<8x128xbf16>, vector<128x8xbf16>, vector<8x8xf32> -> vector<8x8xf32>
    %c0_9 = arith.constant 0 : index
    %c0_10 = arith.constant 0 : index
    %12 = vector.load %arg5[%c0_9, %c0_10] : memref<1x8xf32, #tpu.memory_space<vmem>>, vector<1x8xf32>
    %13 = vector.broadcast %12 : vector<1x8xf32> to vector<8x8xf32>
    %14 = arith.addf %11, %13 : vector<8x8xf32>
    %c0_11 = arith.constant 0 : index
    %c0_12 = arith.constant 0 : index
    %15 = vector.load %arg6[%c0_11, %c0_12] : memref<8x8xf32, #tpu.memory_space<vmem>>, vector<8x8xf32>
    tpu.vector_store %arg6[%c0_11, %c0_12], %14 {strides = array<i32>} : memref<8x8xf32, #tpu.memory_space<vmem>>, vector<8x8xf32>,
    return
  }
  func.func @transform_0(%arg0: i32) -> (i32, i32) {
    %c0_i32 = arith.constant 0 : i32
    %c0_i32_0 = arith.constant 0 : i32
    return %arg0, %c0_i32 : i32, i32
  }
  func.func @transform_1(%arg0: i32) -> (i32, i32) {
    %c0_i32 = arith.constant 0 : i32
    %c0_i32_0 = arith.constant 0 : i32
    %c0_i32_1 = arith.constant 0 : i32
    return %c0_i32, %c0_i32_0 : i32, i32
  }
  func.func @transform_2(%arg0: i32) -> (i32, i32) {
    %c0_i32 = arith.constant 0 : i32
    %c0_i32_0 = arith.constant 0 : i32
    %c0_i32_1 = arith.constant 0 : i32
    return %c0_i32, %c0_i32_0 : i32, i32
  }
  func.func @transform_3(%arg0: i32) -> (i32, i32) {
    %c0_i32 = arith.constant 0 : i32
    %c0_i32_0 = arith.constant 0 : i32
    %c0_i32_1 = arith.constant 0 : i32
    return %c0_i32, %c0_i32_0 : i32, i32
  }
  func.func @transform_4(%arg0: i32) -> (i32, i32) {
    %c0_i32 = arith.constant 0 : i32
    %c0_i32_0 = arith.constant 0 : i32
    %c0_i32_1 = arith.constant 0 : i32
    return %c0_i32, %c0_i32_0 : i32, i32
  }
  func.func @transform_5(%arg0: i32) -> (i32, i32) {
    %c0_i32 = arith.constant 0 : i32
    %c0_i32_0 = arith.constant 0 : i32
    return %arg0, %c0_i32 : i32, i32
  }
}

</mosaic_0001>

<bundles_post_ra>
// kernel: tpu_custom_call.1
= control target key start
LH: loop header
LB: loop body
LE: loop exit
PB: predicated region body
PF: predicated region fallthrough
CT: control target
= control target key end

     0   :  { %s315_s0 = inlined_call_operand.vmem [shape: f32[8,32], index: 0, kind: input, shape index: {}]   ;;  %s316_s1 = inlined_call_operand.vmem [shape: bf16[32,128], index: 1, kind: input, shape index: {}]   ;;  %s317_s2 = inlined_call_operand.vmem [shape: f32[1,128], index: 2, kind: input, shape index: {}]   ;;  %s318_s3 = inlined_call_operand.vmem [shape: bf16[128,8], index: 3, kind: input, shape index: {}]   ;;  %s319_s4 = inlined_call_operand.vmem [shape: f32[1,8], index: 4, kind: input, shape index: {}]   ;;  %s320_s5 = inlined_call_operand.hbm [shape: f32[8,8], index: 5, kind: output, shape index: {}]  }
   0x1   :  { %v204_v0 = vld [vmem:[%s316_s1 + $0x8] sm:$0xff]  ;;  %v212_v1 = vld [vmem:[%s318_s3 + $0x38] sm:$0xff]  ;;  %v203_v2 = vld [vmem:[%s316_s1] sm:$0xff] }
   0x2   :  { %54 = vmatpush.bf16.msra.mxu0 %v204_v0  ;;  %v22_v3 = vld [vmem:[%s315_s0] sm:$0xff]  ;;  %131 = vmatpush.bf16.msra.mxu1 %v212_v1  ;;  %v211_v4 = vld [vmem:[%s318_s3 + $0x30] sm:$0xff] }
   0x3   :  { %10 = vsyncpa [#allocation3], 0  ;;  %v23_v5 = vpack.c.bf16 %v22_v3, %v22_v3  ;;  %vm44_vm0 = vcmask 261120   ;;  %v210_v6 = vld [vmem:[%s318_s3 + $0x28] sm:$0xff]  ;;  %v209_v7 = vld [vmem:[%s318_s3 + $0x20] sm:$0xff]  ;;  %s242_s17 = smov [#allocation2]  }
   0x4   :  { %v208_v8 = vld [vmem:[%s318_s3 + $0x18] sm:$0xff]  ;;  %v207_v9 = vld [vmem:[%s318_s3 + $0x10] sm:$0xff]  ;;  %v206_v10 = vld [vmem:[%s318_s3 + $0x8] sm:$0xff]  ;;  %s151_s18 = sshll.u32 %s242_s17, 4  ;;  %vm144_vm1 = vcmask 64512   ;;  %s152_s18 = int_to_ptr.vmem [resolvable:$true] %s151_s18 }
   0x5   :  { %v205_v11 = vld [vmem:[%s318_s3] sm:$0xff]  ;;  %s153_s3 = sshll.u32 %s320_s5, 4  ;;  %s154_s3 = int_to_ptr.hbm [resolvable:$true] %s153_s3 }
   0x6   :  { %55 = vmatpush.bf16.msra.mxu0 %v203_v2  ;;  %132 = vmatpush.bf16.msra.mxu1 %v211_v4  ;;  %v214_v12 = vld [vmem:[%s317_s2] ss:$0 sm:$0xff] }
   0x7   :  { %v215_v18 = vld [vmem:[%s319_s4] ss:$0 sm:$0xff] }
   0x9   :  { %170 = vmatmul.msk.bf16.vlgmr.msra.gmra.mxu0 %vm44_vm0, %v23_v5 }
   0xa   :  { %133 = vmatpush.bf16.msra.mxu1 %v210_v6 }
   0xe   :  { %134 = vmatpush.bf16.msra.mxu1 %v209_v7 }
  0x12   :  { %135 = vmatpush.bf16.msra.mxu1 %v208_v8 }
  0x16   :  { %136 = vmatpush.bf16.msra.mxu1 %v207_v9 }
  0x1a   :  { %137 = vmatpush.bf16.msra.mxu1 %v206_v10 }
  0x1e   :  { %138 = vmatpush.bf16.msra.mxu1 %v205_v11 }
  0x86   :  { %v57_v13 = vpop.f32.mrf.mxu0 }
  0x87   :  { %v58_v14 = vadd.f32 %v214_v12, %v57_v13 }
  0x89   :  { %v61_v15 = vmax.f32 %v58_v14, 0.0 }
  0x8b   :  { %v62_v16 = vpack.c.bf16 %v61_v15, %v61_v15 }
  0x8d   :  { %139 = vmatmul.bf16.vlgmr.msra.gmra.mxu1 %v62_v16 }
  0x8e   :  { %v59_v17 = vpop.f32.mrf.mxu0 }
 0x10a   :  { %v140_v19 = vpop.f32.mrf.mxu1 }
 0x10b   :  { %v141_v20 = vadd.f32 %v215_v18, %v140_v19 }
 0x10d   :  { %145 = vst.msk [vmem:[#allocation2] sm:$0xff] %vm144_vm1, %v141_v20 }
 0x10e   :  { %156 = dma.vmem_to_hbm [thread:$0]  %s152_s18, 128, %s154_s3, [#allocation3]  }
 0x112   :  { %v142_v21 = vpop.f32.mrf.mxu1 }
 0x113   :  { %240 = dma.done.wait [#allocation3], 128  }
 0x114   :  { %241 = vsyncadd [#allocation3], 4294967168 }
 0x115   :  { %161 = vsyncpa [#allocation3], 1 }

// kernel: tpu_custom_call.1
= control target key start
LH: loop header
LB: loop body
LE: loop exit
PB: predicated region body
PF: predicated region fallthrough
CT: control target
= control target key end

     0   :  { %s315_s0 = inlined_call_operand.vmem [shape: f32[8,32], index: 0, kind: input, shape index: {}]   ;;  %s316_s1 = inlined_call_operand.vmem [shape: bf16[32,128], index: 1, kind: input, shape index: {}]   ;;  %s317_s2 = inlined_call_operand.vmem [shape: f32[1,128], index: 2, kind: input, shape index: {}]   ;;  %s318_s3 = inlined_call_operand.vmem [shape: bf16[128,8], index: 3, kind: input, shape index: {}]   ;;  %s319_s4 = inlined_call_operand.vmem [shape: f32[1,8], index: 4, kind: input, shape index: {}]   ;;  %s320_s5 = inlined_call_operand.hbm [shape: f32[8,8], index: 5, kind: output, shape index: {}]  }
   0x1   :  { %v204_v0 = vld [vmem:[%s316_s1 + $0x8] sm:$0xff]  ;;  %v212_v1 = vld [vmem:[%s318_s3 + $0x38] sm:$0xff]  ;;  %v203_v2 = vld [vmem:[%s316_s1] sm:$0xff] }
   0x2   :  { %54 = vmatpush.bf16.msra.mxu0 %v204_v0  ;;  %v22_v3 = vld [vmem:[%s315_s0] sm:$0xff]  ;;  %131 = vmatpush.bf16.msra.mxu1 %v212_v1  ;;  %v211_v4 = vld [vmem:[%s318_s3 + $0x30] sm:$0xff] }
   0x3   :  { %10 = vsyncpa [#allocation3], 0  ;;  %v23_v5 = vpack.c.bf16 %v22_v3, %v22_v3  ;;  %vm44_vm0 = vcmask 261120   ;;  %v210_v6 = vld [vmem:[%s318_s3 + $0x28] sm:$0xff]  ;;  %v209_v7 = vld [vmem:[%s318_s3 + $0x20] sm:$0xff]  ;;  %s242_s17 = smov [#allocation2]  }
   0x4   :  { %v208_v8 = vld [vmem:[%s318_s3 + $0x18] sm:$0xff]  ;;  %v207_v9 = vld [vmem:[%s318_s3 + $0x10] sm:$0xff]  ;;  %v206_v10 = vld [vmem:[%s318_s3 + $0x8] sm:$0xff]  ;;  %s151_s18 = sshll.u32 %s242_s17, 4  ;;  %vm144_vm1 = vcmask 64512   ;;  %s152_s18 = int_to_ptr.vmem [resolvable:$true] %s151_s18 }
   0x5   :  { %v205_v11 = vld [vmem:[%s318_s3] sm:$0xff]  ;;  %s153_s3 = sshll.u32 %s320_s5, 4  ;;  %s154_s3 = int_to_ptr.hbm [resolvable:$true] %s153_s3 }
   0x6   :  { %55 = vmatpush.bf16.msra.mxu0 %v203_v2  ;;  %132 = vmatpush.bf16.msra.mxu1 %v211_v4  ;;  %v214_v12 = vld [vmem:[%s317_s2] ss:$0 sm:$0xff] }
   0x7   :  { %v215_v18 = vld [vmem:[%s319_s4] ss:$0 sm:$0xff] }
   0x9   :  { %170 = vmatmul.msk.bf16.vlgmr.msra.gmra.mxu0 %vm44_vm0, %v23_v5 }
   0xa   :  { %133 = vmatpush.bf16.msra.mxu1 %v210_v6 }
   0xe   :  { %134 = vmatpush.bf16.msra.mxu1 %v209_v7 }
  0x12   :  { %135 = vmatpush.bf16.msra.mxu1 %v208_v8 }
  0x16   :  { %136 = vmatpush.bf16.msra.mxu1 %v207_v9 }
  0x1a   :  { %137 = vmatpush.bf16.msra.mxu1 %v206_v10 }
  0x1e   :  { %138 = vmatpush.bf16.msra.mxu1 %v205_v11 }
  0x86   :  { %v57_v13 = vpop.f32.mrf.mxu0 }
  0x87   :  { %v58_v14 = vadd.f32 %v214_v12, %v57_v13 }
  0x89   :  { %v61_v15 = vmax.f32 %v58_v14, 0.0 }
  0x8b   :  { %v62_v16 = vpack.c.bf16 %v61_v15, %v61_v15 }
  0x8d   :  { %139 = vmatmul.bf16.vlgmr.msra.gmra.mxu1 %v62_v16 }
  0x8e   :  { %v59_v17 = vpop.f32.mrf.mxu0 }
 0x10a   :  { %v140_v19 = vpop.f32.mrf.mxu1 }
 0x10b   :  { %v141_v20 = vadd.f32 %v215_v18, %v140_v19 }
 0x10d   :  { %145 = vst.msk [vmem:[#allocation2] sm:$0xff] %vm144_vm1, %v141_v20 }
 0x10e   :  { %156 = dma.vmem_to_hbm [thread:$0]  %s152_s18, 128, %s154_s3, [#allocation3]  }
 0x112   :  { %v142_v21 = vpop.f32.mrf.mxu1 }
 0x113   :  { %240 = dma.done.wait [#allocation3], 128  }
 0x114   :  { %241 = vsyncadd [#allocation3], 4294967168 }
 0x115   :  { %161 = vsyncpa [#allocation3], 1 }

</bundles_post_ra>
